<compile_context>
chip_gen: v7x
topology: tpu7x:2x2x1
jax: 0.10.0
libtpu: 0.0.40
codegen_flags: <defaults>
</compile_context>

<pallas_src>
import functools

import jax
import jax.numpy as jnp
from jax import lax
from jax.experimental import pallas as pl
from jax.experimental.pallas import tpu as pltpu


def _round_up(x, m):
    return (x + m - 1) // m * m


def _patch_embed_kernel(p_ref, w_ref, shift_ref, o_ref):
    # p_ref:     [1, Kp, TM] bf16 im2col patch tile (streamed; M in lanes)
    # w_ref:     [Ep, Kp]    bf16 conv weight with BN scale folded in (resident)
    # shift_ref: [Ep, 1]     f32 folded conv-bias/BN shift (resident)
    # o_ref:     [1, Ep, TM] lane-dense output tile (maps directly to NCHW)
    acc = jnp.dot(w_ref[...], p_ref[0], preferred_element_type=jnp.float32)
    o_ref[0] = (acc + shift_ref[...]).astype(o_ref.dtype)


def _im2col_t(x, kh, kw, stride, padding):
    # x: [N, C, H, W] -> patches [N, C*kh*kw, Ho*Wo]
    # K ordered as (c, i, j) to match PyTorch's [E, Cin, kh, kw] weight flatten;
    # M ordered as (ho, wo) so the output reshapes straight to NCHW.
    n, c, h, w = x.shape
    xp = jnp.pad(x, ((0, 0), (0, 0), (padding, padding), (padding, padding)))
    ho = (h + 2 * padding - kh) // stride + 1
    wo = (w + 2 * padding - kw) // stride + 1
    cols = []
    for i in range(kh):
        for j in range(kw):
            cols.append(xp[:, :, i:i + stride * ho:stride,
                              j:j + stride * wo:stride])        # [N, C, Ho, Wo]
    pt = jnp.stack(cols, axis=2)                 # [N, C, kh*kw, Ho, Wo]
    pt = pt.reshape(n, c * kh * kw, ho * wo)     # [N, K, M]
    return pt, ho, wo


@functools.partial(jax.jit, static_argnames=("patch_size", "stride", "padding"))
def overlap_patch_embed(x, conv_w, conv_b, bn_gamma, bn_beta, bn_mean, bn_var,
                        *, patch_size, stride, padding, eps=1e-5):
    """Conv2d(k=patch_size, stride, padding) + BatchNorm2d (eval mode).

    x: [N, Cin, H, W], conv_w: [E, Cin, kh, kw], conv_b/bn_*: [E]
    returns: [N, E, Ho, Wo]
    """
    n, cin, h, w = x.shape
    e = conv_w.shape[0]
    kh = kw = patch_size

    # TODO(synk): fuse im2col into the kernel (memory_space=pl.ANY on padded x,
    # per-step row-band DMA + in-VMEM patch build) to remove the ~(k/stride)^2
    # read duplication; with stride>1 it needs lane-strided gathers, so the
    # host im2col is kept for now.
    xb = x.astype(jnp.bfloat16)                  # cast before im2col: half-width producer
    patches, ho, wo = _im2col_t(xb, kh, kw, stride, padding)   # [N, K, M] bf16
    _, k, m = patches.shape

    # --- tiling / padding ----------------------------------------------------
    kp = _round_up(k, 16)            # bf16 sublane multiple only (NOT 128)
    ep = _round_up(e, 16)            # sublane-only padding; M is the lane dim
    tm_target = 2048                 # large tiles amortize the ~0.35us/step cost
    grid_m = max(1, -(-m // tm_target))
    if n * grid_m < 2 and m > 128:   # keep >= 2 grid steps for megacore (v7x)
        grid_m = 2
    tm = _round_up(-(-m // grid_m), 128)
    mp = tm * grid_m

    patches = jnp.pad(patches, ((0, 0), (0, kp - k), (0, mp - m)))   # [N, Kp, Mp]

    # Fold BN scale into the conv weights in f32, then cast to bf16.
    inv_std = lax.rsqrt(bn_var.astype(jnp.float32) + eps)
    scale = bn_gamma.astype(jnp.float32) * inv_std                   # [E]
    w_mat = conv_w.reshape(e, cin * kh * kw).astype(jnp.float32) * scale[:, None]
    w_mat = jnp.pad(w_mat, ((0, ep - e), (0, kp - k))).astype(jnp.bfloat16)
    shift = (bn_beta.astype(jnp.float32)
             + (conv_b.astype(jnp.float32) - bn_mean.astype(jnp.float32)) * scale)
    shift = jnp.pad(shift, (0, ep - e)).reshape(ep, 1)               # [Ep, 1] f32

    out_itemsize = jnp.dtype(x.dtype).itemsize
    cost = pl.CostEstimate(
        flops=2 * n * m * k * e,
        transcendentals=0,
        bytes_accessed=(n * mp * kp * 2 + ep * kp * 2 + ep * 4
                        + n * mp * ep * out_itemsize),
    )

    out_flat = pl.pallas_call(
        _patch_embed_kernel,
        out_shape=jax.ShapeDtypeStruct((n, ep, mp), x.dtype),
        grid=(n, grid_m),
        in_specs=[
            pl.BlockSpec((1, kp, tm), lambda b, i: (b, 0, i)),   # streamed patches
            pl.BlockSpec((ep, kp), lambda b, i: (0, 0)),         # resident weights
            pl.BlockSpec((ep, 1), lambda b, i: (0, 0)),          # resident BN shift
        ],
        out_specs=pl.BlockSpec((1, ep, tm), lambda b, i: (b, 0, i)),
        compiler_params=pltpu.CompilerParams(
            dimension_semantics=("parallel", "parallel"),
            vmem_limit_bytes=32 * 1024 * 1024,
        ),
        cost_estimate=cost,
    )(patches, w_mat, shift)

    # [N, Ep, Mp] -> [N, E, Ho, Wo]; already NCHW, no transpose pass needed.
    return out_flat[:, :e, :m].reshape(n, e, ho, wo)


if __name__ == "__main__":
    # Module config (small): inplanes=4, embedding_planes=32, patch 7, stride 4, pad 3
    inplanes, embedding_planes = 4, 32
    patch_size, stride, padding = 7, 4, 3
    N, H, W = 2, 16, 16

    key = jax.random.PRNGKey(0)
    kx, kw_, kb, kg, kbe, km, kv = jax.random.split(key, 7)

    x = jax.random.normal(kx, (N, inplanes, H, W), dtype=jnp.float32)
    conv_w = jax.random.normal(
        kw_, (embedding_planes, inplanes, patch_size, patch_size),
        dtype=jnp.float32) * 0.05
    conv_b = jax.random.normal(kb, (embedding_planes,), dtype=jnp.float32) * 0.1
    bn_gamma = 1.0 + 0.1 * jax.random.normal(kg, (embedding_planes,), jnp.float32)
    bn_beta = 0.1 * jax.random.normal(kbe, (embedding_planes,), jnp.float32)
    bn_mean = 0.1 * jax.random.normal(km, (embedding_planes,), jnp.float32)
    bn_var = jnp.abs(jax.random.normal(kv, (embedding_planes,), jnp.float32)) + 0.5

    out = overlap_patch_embed(
        x, conv_w, conv_b, bn_gamma, bn_beta, bn_mean, bn_var,
        patch_size=patch_size, stride=stride, padding=padding)
    out = jax.block_until_ready(out)

    # Reference: XLA conv + eval-mode BatchNorm (f32).
    ref = lax.conv_general_dilated(
        x, conv_w, window_strides=(stride, stride),
        padding=[(padding, padding), (padding, padding)],
        dimension_numbers=("NCHW", "OIHW", "NCHW"))
    ref = ref + conv_b[None, :, None, None]
    ref = (ref - bn_mean[None, :, None, None]) / jnp.sqrt(
        bn_var[None, :, None, None] + 1e-5)
    ref = ref * bn_gamma[None, :, None, None] + bn_beta[None, :, None, None]

    Ho = (H + 2 * padding - patch_size) // stride + 1
    Wo = (W + 2 * padding - patch_size) // stride + 1
    assert out.shape == (N, embedding_planes, Ho, Wo), out.shape
    # bf16 patches/weights with f32 accumulation -> loosened tolerance vs f32 ref.
    assert jnp.allclose(out, ref, atol=2e-2, rtol=2e-2), (
        float(jnp.max(jnp.abs(out - ref))))

    print("KERNEL_OK")
</pallas_src>

<mosaic_0001>
module attributes {stable_mosaic.version = 11 : i64} {
  func.func @_patch_embed_kernel(%arg0: i32, %arg1: i32, %arg2: memref<1x208x128xbf16, #tpu.memory_space<vmem>>, %arg3: memref<32x208xbf16, #tpu.memory_space<vmem>>, %arg4: memref<32x1xf32, #tpu.memory_space<vmem>>, %arg5: memref<1x32x128xf32, #tpu.memory_space<vmem>>) attributes {dimension_semantics = [#tpu.dimension_semantics<parallel>, #tpu.dimension_semantics<parallel>], iteration_bounds = array<i64: 2, 1>, scalar_prefetch = 0 : i64, scratch_operands = 0 : i64, tpu.core_type = #tpu.core_type<tc>, window_params = [{transform_indices = @transform_0, window_bounds = array<i64: 1, 208, 128>}, {pipeline_mode = #tpu.pipeline_mode<synchronous>, transform_indices = @transform_1, window_bounds = array<i64: 32, 208>}, {pipeline_mode = #tpu.pipeline_mode<synchronous>, transform_indices = @transform_2, window_bounds = array<i64: 32, 1>}, {transform_indices = @transform_3, window_bounds = array<i64: 1, 32, 128>}]} {
    %c0 = arith.constant 0 : index
    %c0_0 = arith.constant 0 : index
    %0 = vector.load %arg3[%c0, %c0_0] : memref<32x208xbf16, #tpu.memory_space<vmem>>, vector<32x208xbf16>
    %c0_1 = arith.constant 0 : index
    %c0_2 = arith.constant 0 : index
    %c0_3 = arith.constant 0 : index
    %1 = vector.load %arg2[%c0_1, %c0_2, %c0_3] : memref<1x208x128xbf16, #tpu.memory_space<vmem>>, vector<1x208x128xbf16>
    %2 = vector.shape_cast %1 : vector<1x208x128xbf16> to vector<208x128xbf16>
    %cst = arith.constant dense<0.000000e+00> : vector<32x128xf32>
    %3 = tpu.matmul %0, %2, %cst {dimension_numbers = #tpu.dot_dimension_numbers<[1], [0], [0], [1], [0, 0, 1, 1], [], []>} : vector<32x208xbf16>, vector<208x128xbf16>, vector<32x128xf32> -> vector<32x128xf32>
    %c0_4 = arith.constant 0 : index
    %c0_5 = arith.constant 0 : index
    %4 = vector.load %arg4[%c0_4, %c0_5] : memref<32x1xf32, #tpu.memory_space<vmem>>, vector<32x1xf32>
    %5 = vector.broadcast %4 : vector<32x1xf32> to vector<32x128xf32>
    %6 = arith.addf %3, %5 : vector<32x128xf32>
    %c0_6 = arith.constant 0 : index
    %c0_7 = arith.constant 0 : index
    %c0_8 = arith.constant 0 : index
    %7 = vector.load %arg5[%c0_6, %c0_7, %c0_8] : memref<1x32x128xf32, #tpu.memory_space<vmem>>, vector<1x32x128xf32>
    %8 = vector.shape_cast %7 : vector<1x32x128xf32> to vector<32x128xf32>
    %9 = vector.shape_cast %6 : vector<32x128xf32> to vector<1x32x128xf32>
    tpu.vector_store %arg5[%c0_6, %c0_7, %c0_8], %9 {strides = array<i32>} : memref<1x32x128xf32, #tpu.memory_space<vmem>>, vector<1x32x128xf32>,
    return
  }
  func.func @transform_0(%arg0: i32, %arg1: i32) -> (i32, i32, i32) {
    %c0_i32 = arith.constant 0 : i32
    %c0_i32_0 = arith.constant 0 : i32
    return %arg0, %c0_i32, %arg1 : i32, i32, i32
  }
  func.func @transform_1(%arg0: i32, %arg1: i32) -> (i32, i32) {
    %c0_i32 = arith.constant 0 : i32
    %c0_i32_0 = arith.constant 0 : i32
    %c0_i32_1 = arith.constant 0 : i32
    return %c0_i32, %c0_i32_0 : i32, i32
  }
  func.func @transform_2(%arg0: i32, %arg1: i32) -> (i32, i32) {
    %c0_i32 = arith.constant 0 : i32
    %c0_i32_0 = arith.constant 0 : i32
    %c0_i32_1 = arith.constant 0 : i32
    return %c0_i32, %c0_i32_0 : i32, i32
  }
  func.func @transform_3(%arg0: i32, %arg1: i32) -> (i32, i32, i32) {
    %c0_i32 = arith.constant 0 : i32
    %c0_i32_0 = arith.constant 0 : i32
    return %arg0, %c0_i32, %arg1 : i32, i32, i32
  }
}

</mosaic_0001>

<bundles_post_ra>
// kernel: overlap_patch_embed.1
= control target key start
LH: loop header
LB: loop body
LE: loop exit
PB: predicated region body
PF: predicated region fallthrough
CT: control target
= control target key end

     0   :  { %s644_s12 = smov 0   ;;  %s646_s13 = smov 0   ;;  %s748_s0 = inlined_call_operand.vmem [shape: bf16[2,208,128], index: 0, kind: input, shape index: {}]   ;;  %s749_s1 = inlined_call_operand.vmem [shape: bf16[32,208], index: 1, kind: input, shape index: {}]   ;;  %s750_s2 = inlined_call_operand.vmem [shape: f32[32,1], index: 2, kind: input, shape index: {}]   ;;  %s751_s3 = inlined_call_operand.vmem [shape: f32[2,32,128], index: 3, kind: output, shape index: {}]  }
   0x1   :  { %s648_s14 = smov 0  }
   0x2 LB: > { %s25_s15 = sadd.s32 1, %s617_s13  ;;  %p500_p0 = scmp.ge.s32.totalorder %s621_s14, 1  ;;  %s621_s14 = sphi %s648_s14, %s13_s14   ;;  %s617_s13 = sphi %s646_s13, %s753_s13   ;;  %s613_s12 = sphi %s644_s12, %s752_s12  }
   0x3   : > { %p27_p1 = scmp.ge.s32.totalorder %s25_s15, 2  ;;  %p156_p2 = scmp.lt.s32.totalorder %s621_s14, 3 }
   0x5   : > { %s755_s15 = smov (%p27_p1, %s25_s15), 0  ;;  %p157_p3 = pnand %p500_p0, %p156_p2 }
   0x6   : > { %p186_p4 = scmp.lt.s32.totalorder (!%p157_p3), %s613_s12, 1  ;;  %v623_v0 = vmov (!%p157_p3), 0   ;;  %v595_v1 = vld [vmem:[%s749_s1 + $0x4] ss:$8 sps:$4 sm:$0xff] (!%p157_p3)   ;;  %vm353_vm0 = vcmask (!%p157_p3), 654336   ;;  %v235_v3 = vld [vmem:[%s750_s2 + $0x10] sm:$0xff] (!%p157_p3) }
   0x7   : > { %160 = sbr.rel (%p157_p3) target bundleno = 287 (0x11f), region = 32  ;;  %360 = vmatprep.subr.bf16.mxu0 (!%p157_p3), %v623_v0  ;;  %526 = vmatprep.subr.bf16.mxu1 (!%p157_p3), %v623_v0  ;;  %v598_v2 = vld [vmem:[%s749_s1 + $0x14] ss:$8 sps:$4 sm:$0xff] (!%p157_p3)   ;;  %v233_v4 = vld [vmem:[%s750_s2] sm:$0xff] (!%p157_p3)  ;;  %v234_v6 = vld [vmem:[%s750_s2 + $0x8] sm:$0xff] (!%p157_p3) }
   0x8   : > { %579 = vset.pattern.permute.xlu1 (!%p157_p3), %v623_v0  ;;  %578 = vset.pattern.permute.xlu0 (!%p157_p3), %v623_v0  ;;  %v236_v5 = vld [vmem:[%s750_s2 + $0x18] sm:$0xff] (!%p157_p3)  ;;  %v593_v20 = vld [vmem:[%s749_s1] ss:$8 sps:$4 sm:$0xff] (!%p157_p3)  }
   0x9   : > { %521 = vmatprep.mubr.msk.bf16.mxu0 (!%p157_p3), %vm353_vm0, %v595_v1  ;;  %249 = vperm.xlu1 (!%p157_p3), %579, %v235_v3   ;;  %v596_v21 = vld [vmem:[%s749_s1 + $0x10] ss:$8 sps:$4 sm:$0xff] (!%p157_p3)  }
   0xa   : > { %522 = vmatprep.mubr.msk.bf16.mxu1 (!%p157_p3), %vm353_vm0, %v598_v2  ;;  %239 = vperm.xlu0 (!%p157_p3), %578, %v233_v4  }
   0xd   : > { %254 = vperm.xlu1 (!%p157_p3), %579, %v236_v5  }
   0xe   : > { %s757_s12 = smov (!%p186_p4, %s613_s12), 1  ;;  %244 = vperm.xlu0 %578, %v234_v6  }
   0xf   : > { %s552_s24 = smul.u32 104, %s757_s12  ;;  %s525_s9 = sshll.u32 %s757_s12, 5 }
  0x10   : > { %s201_s16 = scalar_lea.vmem %s751_s3, %s525_s9 }
  0x11   : > { %s690_s4 = scalar_lea.vmem %s748_s0, %s552_s24 }
  0x12   : > { %v580_v7 = vld [vmem:[%s690_s4] sm:$0xff]   ;;  %v581_v8 = vld [vmem:[%s690_s4 + $0x8] sm:$0xff]   ;;  %v582_v9 = vld [vmem:[%s690_s4 + $0x10] sm:$0xff]  }
  0x13   : > { %361 = vmatpush1.bf16.msra.mxu0 %v580_v7  ;;  %539 = vmatpush1.bf16.msra.mxu1 %v580_v7  ;;  %v583_v10 = vld [vmem:[%s690_s4 + $0x18] sm:$0xff]   ;;  %v584_v11 = vld [vmem:[%s690_s4 + $0x20] sm:$0xff]   ;;  %v585_v12 = vld [vmem:[%s690_s4 + $0x28] sm:$0xff]  }
  0x14   : > { %362 = vmatprep.subr.bf16.mxu0 %v623_v0  ;;  %527 = vmatprep.subr.bf16.mxu1 %v623_v0  ;;  %v586_v13 = vld [vmem:[%s690_s4 + $0x30] sm:$0xff]   ;;  %v587_v14 = vld [vmem:[%s690_s4 + $0x38] sm:$0xff]   ;;  %v588_v15 = vld [vmem:[%s690_s4 + $0x40] sm:$0xff]  }
  0x15   : > { %v589_v16 = vld [vmem:[%s690_s4 + $0x48] sm:$0xff]   ;;  %v590_v17 = vld [vmem:[%s690_s4 + $0x50] sm:$0xff]   ;;  %v591_v18 = vld [vmem:[%s690_s4 + $0x58] sm:$0xff]  }
  0x16   : > { %v592_v19 = vld [vmem:[%s690_s4 + $0x60] sm:$0xff]  }
  0x17   : > { %363 = vmatpush1.bf16.msra.mxu0 %v581_v8  ;;  %540 = vmatpush1.bf16.msra.mxu1 %v581_v8 }
  0x18   : > { %364 = vmatprep.subr.bf16.mxu0 %v623_v0  ;;  %528 = vmatprep.subr.bf16.mxu1 %v623_v0 }
  0x1b   : > { %365 = vmatpush1.bf16.msra.mxu0 %v582_v9  ;;  %541 = vmatpush1.bf16.msra.mxu1 %v582_v9 }
  0x1c   : > { %366 = vmatprep.subr.bf16.mxu0 %v623_v0  ;;  %529 = vmatprep.subr.bf16.mxu1 %v623_v0 }
  0x1f   : > { %367 = vmatpush1.bf16.msra.mxu0 %v583_v10  ;;  %542 = vmatpush1.bf16.msra.mxu1 %v583_v10 }
  0x20   : > { %368 = vmatprep.subr.bf16.mxu0 %v623_v0  ;;  %530 = vmatprep.subr.bf16.mxu1 %v623_v0 }
  0x23   : > { %369 = vmatpush1.bf16.msra.mxu0 %v584_v11  ;;  %543 = vmatpush1.bf16.msra.mxu1 %v584_v11 }
  0x24   : > { %370 = vmatprep.subr.bf16.mxu0 %v623_v0  ;;  %531 = vmatprep.subr.bf16.mxu1 %v623_v0 }
  0x27   : > { %371 = vmatpush1.bf16.msra.mxu0 %v585_v12  ;;  %544 = vmatpush1.bf16.msra.mxu1 %v585_v12 }
  0x28   : > { %372 = vmatprep.subr.bf16.mxu0 %v623_v0  ;;  %532 = vmatprep.subr.bf16.mxu1 %v623_v0 }
  0x2b   : > { %373 = vmatpush1.bf16.msra.mxu0 %v586_v13  ;;  %545 = vmatpush1.bf16.msra.mxu1 %v586_v13 }
  0x2c   : > { %374 = vmatprep.subr.bf16.mxu0 %v623_v0  ;;  %533 = vmatprep.subr.bf16.mxu1 %v623_v0 }
  0x2f   : > { %375 = vmatpush1.bf16.msra.mxu0 %v587_v14  ;;  %546 = vmatpush1.bf16.msra.mxu1 %v587_v14 }
  0x30   : > { %376 = vmatprep.subr.bf16.mxu0 %v623_v0  ;;  %534 = vmatprep.subr.bf16.mxu1 %v623_v0 }
  0x33   : > { %377 = vmatpush1.bf16.msra.mxu0 %v588_v15  ;;  %547 = vmatpush1.bf16.msra.mxu1 %v588_v15 }
  0x34   : > { %378 = vmatprep.subr.bf16.mxu0 %v623_v0  ;;  %535 = vmatprep.subr.bf16.mxu1 %v623_v0 }
  0x37   : > { %379 = vmatpush1.bf16.msra.mxu0 %v589_v16  ;;  %548 = vmatpush1.bf16.msra.mxu1 %v589_v16 }
  0x38   : > { %380 = vmatprep.subr.bf16.mxu0 %v623_v0  ;;  %536 = vmatprep.subr.bf16.mxu1 %v623_v0 }
  0x3b   : > { %381 = vmatpush1.bf16.msra.mxu0 %v590_v17  ;;  %549 = vmatpush1.bf16.msra.mxu1 %v590_v17 }
  0x3c   : > { %382 = vmatprep.subr.bf16.mxu0 %v623_v0  ;;  %537 = vmatprep.subr.bf16.mxu1 %v623_v0 }
  0x3f   : > { %383 = vmatpush1.bf16.msra.mxu0 %v591_v18  ;;  %550 = vmatpush1.bf16.msra.mxu1 %v591_v18 }
  0x40   : > { %384 = vmatprep.subr.bf16.mxu0 %v623_v0  ;;  %538 = vmatprep.subr.bf16.mxu1 %v623_v0 }
  0x43   : > { %385 = vmatpush1.bf16.msra.mxu0 %v592_v19  ;;  %551 = vmatpush1.bf16.msra.mxu1 %v592_v19 }
  0x46   : > { %393 = vmatmul.mubr.bf16.vlgmr.msra.gmra.mrb[0].mxu0 %v593_v20  ;;  %401 = vmatmul.mubr.bf16.vlgmr.msra.gmra.mrb[0].mxu1 %v596_v21 }
  0x88   : > { %v250_v22 = vpop.permute.xlu1 %249 }
  0x89   : > { %v240_v23 = vpop.permute.xlu0 %239 }
  0x8c   : > { %v255_v24 = vpop.permute.xlu1 %254 }
  0x8d   : > { %v245_v25 = vpop.permute.xlu0 %244 }
 0x119   : > { %v394_v26 = vpop.f32.mrb[0].mxu0  ;;  %v402_v27 = vpop.f32.mrb[0].mxu1 }
 0x11a   : > { %v395_v28 = vadd.f32 %v394_v26, %v240_v23  ;;  %v403_v29 = vadd.f32 %v402_v27, %v250_v22  ;;  %v396_v30 = vpop.f32.mrb[1].mxu0  ;;  %v404_v31 = vpop.f32.mrb[1].mxu1 }
 0x11b   : > { %v397_v32 = vpop.f32.mrb[2].mxu0  ;;  %v405_v33 = vpop.f32.mrb[2].mxu1 }
 0x11c   : > { %409 = vst [vmem:[%s201_s16] sm:$0xff] %v395_v28  ;;  %411 = vst [vmem:[%s201_s16 + $0x10] sm:$0xff] %v403_v29  ;;  %v398_v34 = vadd.f32 %v397_v32, %v245_v25  ;;  %v406_v35 = vadd.f32 %v405_v33, %v255_v24  ;;  %v399_v36 = vpop.f32.mrb[3].mxu0  ;;  %v407_v37 = vpop.f32.mrb[3].mxu1 }
 0x11e   : > { %410 = vst [vmem:[%s201_s16 + $0x8] sm:$0xff] %v398_v34  ;;  %412 = vst [vmem:[%s201_s16 + $0x18] sm:$0xff] %v406_v35 }
 0x11f PF: > { %s13_s14 = sadd.s32 1, %s621_s14   ;;  %s752_s12 = smov %s617_s13 }
 0x120   : > { %p10_p5 = scmp.ge.s32.totalorder %s13_s14, 4   ;;  %s753_s13 = smov %s755_s15 }
 0x122   :  { %12 = sbr.rel (!%p10_p5) target bundleno = 2 (0x2), region = 62 }

</bundles_post_ra>
